<compile_context>
chip_gen: v5e
topology: v5e:2x2
jax: 0.10.0
libtpu: 0.0.40
codegen_flags: <defaults>
</compile_context>

<pallas_src>
import jax
import jax.numpy as jnp
from jax import lax
from jax.experimental import pallas as pl
from jax.experimental.pallas import tpu as pltpu


# ---------------------------------------------------------------------------
# Kernel 1: CLIP contrastive loss (single block — B and D are small)
#   - project pooled speech / text features into the joint embedding space
#   - L2-normalize, scaled similarity, symmetric cross-entropy
# ---------------------------------------------------------------------------
def _clip_loss_kernel(sfeat_ref, ws_ref, tfeat_ref, wt_ref, scale_ref, out_ref):
    # MXU matmuls: bf16 inputs, f32 accumulation.
    s = jnp.dot(sfeat_ref[...], ws_ref[...], preferred_element_type=jnp.float32)
    t = jnp.dot(tfeat_ref[...], wt_ref[...], preferred_element_type=jnp.float32)

    # L2 normalize along the embedding dim (f32).
    s = s * lax.rsqrt(jnp.sum(s * s, axis=-1, keepdims=True) + 1e-12)
    t = t * lax.rsqrt(jnp.sum(t * t, axis=-1, keepdims=True) + 1e-12)

    scale = scale_ref[0, 0]
    s_bf = s.astype(jnp.bfloat16)
    t_bf = t.astype(jnp.bfloat16)

    # Two small matmuls instead of a sublane-direction (axis=0) softmax:
    # both directions reuse the same lane-major reduction code path; the MXU
    # is otherwise idle here so the second matmul is effectively free.
    logits_st = scale * jnp.dot(s_bf, t_bf.T, preferred_element_type=jnp.float32)
    logits_ts = scale * jnp.dot(t_bf, s_bf.T, preferred_element_type=jnp.float32)

    B = logits_st.shape[0]
    row = lax.broadcasted_iota(jnp.int32, (B, B), 0)
    col = lax.broadcasted_iota(jnp.int32, (B, B), 1)
    diag_mask = row == col
    inv_b = 1.0 / B  # static

    def _row_ce(logits):
        diag = jnp.sum(jnp.where(diag_mask, logits, 0.0), axis=-1, keepdims=True)
        m = jnp.max(logits, axis=-1, keepdims=True)
        lse = m + jnp.log(jnp.sum(jnp.exp(logits - m), axis=-1, keepdims=True))
        return jnp.sum(lse - diag) * inv_b

    out_ref[0, 0] = 0.5 * (_row_ce(logits_st) + _row_ce(logits_ts))


# ---------------------------------------------------------------------------
# Kernel 2: causal-LM cross-entropy, tiled over (rows, vocab)
#   logits_tile = hidden_tile @ w_vocab_tile  (bf16 MXU, f32 accumulate)
#   online logsumexp across vocab tiles; gold logit accumulated per tile.
#   Per-row CE (already masked) is the output; final mean happens in JAX.
# ---------------------------------------------------------------------------
def _lm_ce_kernel(hidden_ref,               # (TILE_N, H)   bf16
                  wv_ref,                   # (H, TILE_V)   bf16
                  labels_ref,               # (TILE_N, 1)   int32
                  mask_ref,                 # (TILE_N, 1)   f32
                  ce_ref,                   # output: (TILE_N, 1) f32 per row
                  m_acc, l_acc, g_acc):     # VMEM scratch (TILE_N, 1) f32
    v = pl.program_id(1)

    @pl.when(v == 0)
    def _():
        m_acc[...] = jnp.full(m_acc.shape, -1e30, jnp.float32)
        l_acc[...] = jnp.zeros(l_acc.shape, jnp.float32)
        g_acc[...] = jnp.zeros(g_acc.shape, jnp.float32)

    tile_n = hidden_ref.shape[0]
    tile_v = wv_ref.shape[1]

    logits = jnp.dot(hidden_ref[...], wv_ref[...],
                     preferred_element_type=jnp.float32)          # (TILE_N, TILE_V)

    # Gold logit: compare labels against this tile's vocab id range only.
    col_ids = v * tile_v + lax.broadcasted_iota(jnp.int32, (tile_n, tile_v), 1)
    g_acc[...] += jnp.sum(jnp.where(col_ids == labels_ref[...], logits, 0.0),
                          axis=-1, keepdims=True)

    # Online (blockwise) logsumexp across vocab tiles.
    m_old = m_acc[...]
    m_new = jnp.maximum(m_old, jnp.max(logits, axis=-1, keepdims=True))
    l_acc[...] = jnp.exp(m_old - m_new) * l_acc[...] + jnp.sum(
        jnp.exp(logits - m_new), axis=-1, keepdims=True)
    m_acc[...] = m_new

    @pl.when(v == pl.num_programs(1) - 1)
    def _():
        lse = m_acc[...] + jnp.log(l_acc[...])
        # Rows of a ragged last tile (if any) contain garbage but are clipped
        # on writeback, so no explicit row mask is needed here.
        ce_ref[...] = (lse - g_acc[...]) * mask_ref[...]          # per-row CE


# ---------------------------------------------------------------------------
# Wrappers
# ---------------------------------------------------------------------------
def clip_contrastive_loss(speech_pooled, w_speech_proj, text_pooled, w_text_proj,
                          logit_scale):
    scale_2d = jnp.reshape(logit_scale.astype(jnp.float32), (1, 1))
    vmem = pl.BlockSpec(memory_space=pltpu.MemorySpace.VMEM)
    smem = pl.BlockSpec(memory_space=pltpu.MemorySpace.SMEM)
    out = pl.pallas_call(
        _clip_loss_kernel,
        out_shape=jax.ShapeDtypeStruct((1, 1), jnp.float32),
        in_specs=[vmem, vmem, vmem, vmem, smem],
        out_specs=smem,
    )(speech_pooled.astype(jnp.bfloat16), w_speech_proj.astype(jnp.bfloat16),
      text_pooled.astype(jnp.bfloat16), w_text_proj.astype(jnp.bfloat16),
      scale_2d)
    return out[0, 0]


def causal_lm_loss(hidden_flat, w_vocab, labels_flat, mask_flat,
                   *, tile_n=64, tile_v=128):
    """Tiled, online-logsumexp causal-LM cross-entropy.

    Toy tile sizes (64, 128).  For real model sizes re-derive from VMEM:
    e.g. v7x (64 MiB/TC): TILE_N=256, TILE_V=2048 bf16; v5e: keep tiles at
    128-multiples (4x128x128 MXU), don't oversize just to match a 256 MXU.
    """
    N, H = hidden_flat.shape
    V = w_vocab.shape[1]
    grid = (pl.cdiv(N, tile_n), pl.cdiv(V, tile_v))

    grid_spec = pltpu.PrefetchScalarGridSpec(
        num_scalar_prefetch=0,
        grid=grid,
        in_specs=[
            pl.BlockSpec((tile_n, H), lambda n, v: (n, 0)),
            pl.BlockSpec((H, tile_v), lambda n, v: (0, v)),
            pl.BlockSpec((tile_n, 1), lambda n, v: (n, 0)),
            pl.BlockSpec((tile_n, 1), lambda n, v: (n, 0)),
        ],
        out_specs=pl.BlockSpec((tile_n, 1), lambda n, v: (n, 0)),
        scratch_shapes=[pltpu.VMEM((tile_n, 1), jnp.float32)] * 3,
    )
    ce_rows = pl.pallas_call(
        _lm_ce_kernel,
        out_shape=jax.ShapeDtypeStruct((N, 1), jnp.float32),
        grid_spec=grid_spec,
        compiler_params=pltpu.CompilerParams(
            # rows sharded across TensorCores (v7x megacore); vocab is the
            # reduction axis, kept last / arbitrary.
            dimension_semantics=("parallel", "arbitrary"),
            vmem_limit_bytes=32 * 1024 * 1024,
        ),
    )(hidden_flat.astype(jnp.bfloat16),   # bf16 stream halves HBM bytes
      w_vocab.astype(jnp.bfloat16),
      labels_flat.astype(jnp.int32),
      mask_flat.astype(jnp.float32))
    # mask sum is available host-side already; ce_rows is pre-masked.
    return jnp.sum(ce_rows) / jnp.maximum(jnp.sum(mask_flat.astype(jnp.float32)), 1.0)


def dialect_clip_train_forward(params, speech, input_ids, attention_mask,
                               alpha=0.5, beta=0.5):
    """Synthetic stand-in for DialectCLIP.train_forward / forward_fn.

    Returns alpha * loss_clip + beta * loss_causallm (scalar).
    """
    # TODO(synk): the real Whisper speech encoder / LLM text backbone of
    # DialectCLIPForConditionalGeneration are not available; they are replaced
    # by deterministic pooling + linear projections (glue) feeding the Pallas
    # loss kernels.  The dialect-speech branch of train_forward would reuse
    # the same CLIP kernel on a second pooled-feature pair.
    B, S = input_ids.shape

    # ---- "speech encoder": mean pool over time -> (B, F_mel)
    speech_pooled = jnp.mean(speech, axis=1)

    # ---- "text encoder": token embedding + masked mean pool -> (B, H)
    text_hidden = params["tok_emb"][input_ids]                       # (B, S, H)
    mask_f = attention_mask.astype(jnp.float32)[..., None]           # (B, S, 1)
    text_pooled = jnp.sum(text_hidden * mask_f, axis=1) / jnp.maximum(
        jnp.sum(mask_f, axis=1), 1.0)

    # ---- CLIP contrastive loss (Pallas kernel)
    loss_clip = clip_contrastive_loss(
        speech_pooled, params["w_speech_proj"],
        text_pooled, params["w_text_proj"],
        params["logit_scale"])

    # ---- causal LM hidden states: tokens conditioned on speech context
    # TODO(synk): at real scale this add + the pooling above should be fused
    # into the LM Pallas kernel to keep `hidden` out of HBM.
    speech_ctx = speech_pooled @ params["w_speech_to_h"]             # (B, H)
    hidden = text_hidden + speech_ctx[:, None, :]                    # (B, S, H)

    # shifted CE: position t predicts token t+1
    hidden_shift = hidden[:, :-1, :]                                 # (B, S-1, H)
    labels_shift = input_ids[:, 1:]                                  # (B, S-1)
    mask_shift = attention_mask[:, 1:].astype(jnp.float32)           # (B, S-1)

    H = hidden.shape[-1]
    N = B * (S - 1)
    # No HBM-side padding: ragged last row tiles (if N % tile_n != 0) are
    # handled by output-writeback clipping inside the kernel pipeline.
    hidden_flat = hidden_shift.reshape(N, H)
    labels_flat = labels_shift.reshape(N, 1)
    mask_flat = mask_shift.reshape(N, 1)

    loss_lm = causal_lm_loss(hidden_flat, params["w_vocab"],
                             labels_flat, mask_flat)

    return alpha * loss_clip + beta * loss_lm


# ---------------------------------------------------------------------------
# Pure-JAX reference (mirrors the kernel's bf16 rounding) for correctness.
# ---------------------------------------------------------------------------
def _ref_train_forward(params, speech, input_ids, attention_mask,
                       alpha=0.5, beta=0.5):
    bf = lambda x: x.astype(jnp.bfloat16).astype(jnp.float32)
    B, S = input_ids.shape

    speech_pooled = jnp.mean(speech, axis=1)
    text_hidden = params["tok_emb"][input_ids]
    mask_f = attention_mask.astype(jnp.float32)[..., None]
    text_pooled = jnp.sum(text_hidden * mask_f, axis=1) / jnp.maximum(
        jnp.sum(mask_f, axis=1), 1.0)

    s = bf(speech_pooled) @ bf(params["w_speech_proj"])
    t = bf(text_pooled) @ bf(params["w_text_proj"])
    s = s * lax.rsqrt(jnp.sum(s * s, axis=-1, keepdims=True) + 1e-12)
    t = t * lax.rsqrt(jnp.sum(t * t, axis=-1, keepdims=True) + 1e-12)
    logits = params["logit_scale"].astype(jnp.float32) * (bf(s) @ bf(t).T)
    idx = jnp.arange(B)
    ce_st = jnp.mean(jax.nn.logsumexp(logits, axis=-1) - logits[idx, idx])
    ce_ts = jnp.mean(jax.nn.logsumexp(logits.T, axis=-1) - logits.T[idx, idx])
    loss_clip = 0.5 * (ce_st + ce_ts)

    speech_ctx = speech_pooled @ params["w_speech_to_h"]
    hidden = text_hidden + speech_ctx[:, None, :]
    hflat = hidden[:, :-1, :].reshape(-1, hidden.shape[-1])
    lbl = input_ids[:, 1:].reshape(-1)
    msk = attention_mask[:, 1:].astype(jnp.float32).reshape(-1)
    lm_logits = bf(hflat) @ bf(params["w_vocab"])
    lse = jax.nn.logsumexp(lm_logits, axis=-1)
    gold = jnp.take_along_axis(lm_logits, lbl[:, None], axis=-1)[:, 0]
    loss_lm = jnp.sum((lse - gold) * msk) / jnp.maximum(jnp.sum(msk), 1.0)

    return alpha * loss_clip + beta * loss_lm


# ---------------------------------------------------------------------------
if __name__ == "__main__":
    key = jax.random.PRNGKey(0)
    ks = jax.random.split(key, 8)

    # Small shapes consistent with the module's data flow.
    B, T, F_MEL = 8, 16, 128         # speech features [B, T, F_mel]
    S, H, D, V = 17, 128, 128, 512   # seq len, hidden, joint embed dim, vocab
    # N = B*(S-1) = 128 rows -> 2 row tiles of 64; V=512 -> 4 vocab tiles of 128.

    # Inputs (what the collate_fn would produce, at toy scale).
    speech = jax.random.normal(ks[0], (B, T, F_MEL), jnp.float32)
    input_ids = jax.random.randint(ks[1], (B, S), 0, V, dtype=jnp.int32)
    attention_mask = jnp.ones((B, S), jnp.int32)

    # Deterministic synthetic parameters (no checkpoint loading).
    params = {
        "tok_emb":        0.02 * jax.random.normal(ks[2], (V, H), jnp.float32),
        "w_speech_proj":  0.02 * jax.random.normal(ks[3], (F_MEL, D), jnp.float32),
        "w_text_proj":    0.02 * jax.random.normal(ks[4], (H, D), jnp.float32),
        "w_speech_to_h":  0.02 * jax.random.normal(ks[5], (F_MEL, H), jnp.float32),
        "w_vocab":        0.02 * jax.random.normal(ks[6], (H, V), jnp.float32),
        "logit_scale":    jnp.float32(1.0 / 0.07),   # CLIP logit scale init
    }

    loss = dialect_clip_train_forward(params, speech, input_ids, attention_mask,
                                      alpha=0.5, beta=0.5)
    loss = jax.block_until_ready(loss)
    assert jnp.isfinite(loss), "loss is not finite"

    loss_ref = jax.block_until_ready(
        _ref_train_forward(params, speech, input_ids, attention_mask,
                           alpha=0.5, beta=0.5))
    assert jnp.allclose(loss, loss_ref, rtol=1e-2, atol=1e-2), (
        f"kernel loss {float(loss)} != reference {float(loss_ref)}")

    print("KERNEL_OK")
</pallas_src>

<mosaic_0001>
module attributes {stable_mosaic.version = 11 : i64} {
  func.func @_clip_loss_kernel(%arg0: memref<8x128xbf16, #tpu.memory_space<vmem>>, %arg1: memref<128x128xbf16, #tpu.memory_space<vmem>>, %arg2: memref<8x128xbf16, #tpu.memory_space<vmem>>, %arg3: memref<128x128xbf16, #tpu.memory_space<vmem>>, %arg4: memref<1x1xf32, #tpu.memory_space<smem>>, %arg5: memref<1x1xf32, #tpu.memory_space<smem>>) attributes {dimension_semantics = [], scalar_prefetch = 0 : i64, scratch_operands = 0 : i64, tpu.core_type = #tpu.core_type<tc>} {
    %c0 = arith.constant 0 : index
    %c0_0 = arith.constant 0 : index
    %0 = vector.load %arg0[%c0, %c0_0] : memref<8x128xbf16, #tpu.memory_space<vmem>>, vector<8x128xbf16>
    %c0_1 = arith.constant 0 : index
    %c0_2 = arith.constant 0 : index
    %1 = vector.load %arg1[%c0_1, %c0_2] : memref<128x128xbf16, #tpu.memory_space<vmem>>, vector<128x128xbf16>
    %cst = arith.constant dense<0.000000e+00> : vector<8x128xf32>
    %2 = tpu.matmul %0, %1, %cst {dimension_numbers = #tpu.dot_dimension_numbers<[1], [0], [0], [1], [0, 0, 1, 1], [], []>} : vector<8x128xbf16>, vector<128x128xbf16>, vector<8x128xf32> -> vector<8x128xf32>
    %c0_3 = arith.constant 0 : index
    %c0_4 = arith.constant 0 : index
    %3 = vector.load %arg2[%c0_3, %c0_4] : memref<8x128xbf16, #tpu.memory_space<vmem>>, vector<8x128xbf16>
    %c0_5 = arith.constant 0 : index
    %c0_6 = arith.constant 0 : index
    %4 = vector.load %arg3[%c0_5, %c0_6] : memref<128x128xbf16, #tpu.memory_space<vmem>>, vector<128x128xbf16>
    %cst_7 = arith.constant dense<0.000000e+00> : vector<8x128xf32>
    %5 = tpu.matmul %3, %4, %cst_7 {dimension_numbers = #tpu.dot_dimension_numbers<[1], [0], [0], [1], [0, 0, 1, 1], [], []>} : vector<8x128xbf16>, vector<128x128xbf16>, vector<8x128xf32> -> vector<8x128xf32>
    %6 = arith.mulf %2, %2 : vector<8x128xf32>
    %cst_8 = arith.constant dense<0.000000e+00> : vector<8xf32>
    %7 = vector.multi_reduction <add>, %6, %cst_8 [1] : vector<8x128xf32> to vector<8xf32>
    %8 = vector.shape_cast %7 : vector<8xf32> to vector<8x1xf32>
    %cst_9 = arith.constant 9.99999996E-13 : f32
    %9 = vector.broadcast %cst_9 : f32 to vector<8x1xf32>
    %10 = arith.addf %8, %9 : vector<8x1xf32>
    %11 = math.rsqrt %10 : vector<8x1xf32>
    %12 = vector.broadcast %11 : vector<8x1xf32> to vector<8x128xf32>
    %13 = arith.mulf %2, %12 : vector<8x128xf32>
    %14 = arith.mulf %5, %5 : vector<8x128xf32>
    %cst_10 = arith.constant dense<0.000000e+00> : vector<8xf32>
    %15 = vector.multi_reduction <add>, %14, %cst_10 [1] : vector<8x128xf32> to vector<8xf32>
    %16 = vector.shape_cast %15 : vector<8xf32> to vector<8x1xf32>
    %cst_11 = arith.constant 9.99999996E-13 : f32
    %17 = vector.broadcast %cst_11 : f32 to vector<8x1xf32>
    %18 = arith.addf %16, %17 : vector<8x1xf32>
    %19 = math.rsqrt %18 : vector<8x1xf32>
    %20 = vector.broadcast %19 : vector<8x1xf32> to vector<8x128xf32>
    %21 = arith.mulf %5, %20 : vector<8x128xf32>
    %c0_12 = arith.constant 0 : index
    %c0_13 = arith.constant 0 : index
    %22 = memref.load %arg4[%c0_12, %c0_13] : memref<1x1xf32, #tpu.memory_space<smem>>
    %23 = arith.truncf %13 : vector<8x128xf32> to vector<8x128xbf16>
    %24 = arith.truncf %21 : vector<8x128xf32> to vector<8x128xbf16>
    %25 = tpu.transpose %24, [1, 0] : vector<8x128xbf16> -> vector<128x8xbf16>
    %cst_14 = arith.constant dense<0.000000e+00> : vector<8x8xf32>
    %26 = tpu.matmul %23, %25, %cst_14 {dimension_numbers = #tpu.dot_dimension_numbers<[1], [0], [0], [1], [0, 0, 1, 1], [], []>} : vector<8x128xbf16>, vector<128x8xbf16>, vector<8x8xf32> -> vector<8x8xf32>
    %27 = vector.broadcast %22 : f32 to vector<8x8xf32>
    %28 = arith.mulf %27, %26 : vector<8x8xf32>
    %29 = tpu.transpose %23, [1, 0] : vector<8x128xbf16> -> vector<128x8xbf16>
    %cst_15 = arith.constant dense<0.000000e+00> : vector<8x8xf32>
    %30 = tpu.matmul %24, %29, %cst_15 {dimension_numbers = #tpu.dot_dimension_numbers<[1], [0], [0], [1], [0, 0, 1, 1], [], []>} : vector<8x128xbf16>, vector<128x8xbf16>, vector<8x8xf32> -> vector<8x8xf32>
    %31 = vector.broadcast %22 : f32 to vector<8x8xf32>
    %32 = arith.mulf %31, %30 : vector<8x8xf32>
    %33 = tpu.iota {dimensions = array<i32: 0>} : vector<8x8xi32>
    %34 = tpu.iota {dimensions = array<i32: 1>} : vector<8x8xi32>
    %35 = arith.cmpi eq, %33, %34 : vector<8x8xi32>
    %cst_16 = arith.constant 0.000000e+00 : f32
    %36 = vector.broadcast %cst_16 : f32 to vector<8x8xf32>
    %37 = arith.select %35, %28, %36 : vector<8x8xi1>, vector<8x8xf32>
    %cst_17 = arith.constant dense<0.000000e+00> : vector<8xf32>
    %38 = vector.multi_reduction <add>, %37, %cst_17 [1] : vector<8x8xf32> to vector<8xf32>
    %39 = vector.shape_cast %38 : vector<8xf32> to vector<8x1xf32>
    %cst_18 = arith.constant dense<0xFF800000> : vector<8xf32>
    %40 = vector.multi_reduction <maximumf>, %28, %cst_18 [1] : vector<8x8xf32> to vector<8xf32>
    %41 = vector.shape_cast %40 : vector<8xf32> to vector<8x1xf32>
    %42 = vector.broadcast %41 : vector<8x1xf32> to vector<8x8xf32>
    %43 = arith.subf %28, %42 : vector<8x8xf32>
    %44 = math.exp %43 : vector<8x8xf32>
    %cst_19 = arith.constant dense<0.000000e+00> : vector<8xf32>
    %45 = vector.multi_reduction <add>, %44, %cst_19 [1] : vector<8x8xf32> to vector<8xf32>
    %46 = vector.shape_cast %45 : vector<8xf32> to vector<8x1xf32>
    %47 = math.log %46 : vector<8x1xf32>
    %48 = arith.addf %41, %47 : vector<8x1xf32>
    %49 = arith.subf %48, %39 : vector<8x1xf32>
    %50 = vector.shape_cast %49 : vector<8x1xf32> to vector<1x8x1xf32>
    %cst_20 = arith.constant dense<0.000000e+00> : vector<1xf32>
    %51 = vector.multi_reduction <add>, %50, %cst_20 [1, 2] : vector<1x8x1xf32> to vector<1xf32>
    %52 = vector.shape_cast %51 : vector<1xf32> to vector<1x1x1xf32>
    %53 = vector.extract %52[0, 0, 0] : f32 from vector<1x1x1xf32>
    %cst_21 = arith.constant 1.250000e-01 : f32
    %54 = arith.mulf %53, %cst_21 : f32
    %cst_22 = arith.constant 0.000000e+00 : f32
    %55 = vector.broadcast %cst_22 : f32 to vector<8x8xf32>
    %56 = arith.select %35, %32, %55 : vector<8x8xi1>, vector<8x8xf32>
    %cst_23 = arith.constant dense<0.000000e+00> : vector<8xf32>
    %57 = vector.multi_reduction <add>, %56, %cst_23 [1] : vector<8x8xf32> to vector<8xf32>
    %58 = vector.shape_cast %57 : vector<8xf32> to vector<8x1xf32>
    %cst_24 = arith.constant dense<0xFF800000> : vector<8xf32>
    %59 = vector.multi_reduction <maximumf>, %32, %cst_24 [1] : vector<8x8xf32> to vector<8xf32>
    %60 = vector.shape_cast %59 : vector<8xf32> to vector<8x1xf32>
    %61 = vector.broadcast %60 : vector<8x1xf32> to vector<8x8xf32>
    %62 = arith.subf %32, %61 : vector<8x8xf32>
    %63 = math.exp %62 : vector<8x8xf32>
    %cst_25 = arith.constant dense<0.000000e+00> : vector<8xf32>
    %64 = vector.multi_reduction <add>, %63, %cst_25 [1] : vector<8x8xf32> to vector<8xf32>
    %65 = vector.shape_cast %64 : vector<8xf32> to vector<8x1xf32>
    %66 = math.log %65 : vector<8x1xf32>
    %67 = arith.addf %60, %66 : vector<8x1xf32>
    %68 = arith.subf %67, %58 : vector<8x1xf32>
    %69 = vector.shape_cast %68 : vector<8x1xf32> to vector<1x8x1xf32>
    %cst_26 = arith.constant dense<0.000000e+00> : vector<1xf32>
    %70 = vector.multi_reduction <add>, %69, %cst_26 [1, 2] : vector<1x8x1xf32> to vector<1xf32>
    %71 = vector.shape_cast %70 : vector<1xf32> to vector<1x1x1xf32>
    %72 = vector.extract %71[0, 0, 0] : f32 from vector<1x1x1xf32>
    %cst_27 = arith.constant 1.250000e-01 : f32
    %73 = arith.mulf %72, %cst_27 : f32
    %74 = arith.addf %54, %73 : f32
    %cst_28 = arith.constant 5.000000e-01 : f32
    %75 = arith.mulf %cst_28, %74 : f32
    %c0_29 = arith.constant 0 : index
    %c0_30 = arith.constant 0 : index
    %76 = memref.load %arg5[%c0_29, %c0_30] : memref<1x1xf32, #tpu.memory_space<smem>>
    memref.store %75, %arg5[%c0_29, %c0_30] : memref<1x1xf32, #tpu.memory_space<smem>>
    return
  }
}

</mosaic_0001>

<bundles_post_ra>
// kernel: tpu_custom_call.1
= control target key start
LH: loop header
LB: loop body
LE: loop exit
PB: predicated region body
PF: predicated region fallthrough
CT: control target
= control target key end

     0   :  { %11 = vsyncpa [#allocation4], 0  ;;  %s665_s0 = inlined_call_operand.hbm [shape: bf16[8,128], index: 0, kind: input, shape index: {}]   ;;  %s666_s1 = inlined_call_operand.hbm [shape: bf16[128,128], index: 1, kind: input, shape index: {}]   ;;  %s667_s2 = inlined_call_operand.hbm [shape: bf16[8,128], index: 2, kind: input, shape index: {}]   ;;  %s668_s3 = inlined_call_operand.hbm [shape: bf16[128,128], index: 3, kind: input, shape index: {}]   ;;  %s669_s4 = inlined_call_operand.<no memory space> [shape: f32[1,1], index: 4, kind: input, shape index: {}]   ;;  %s670_s5 = inlined_call_operand.hbm [shape: f32[1,1], index: 5, kind: output, shape index: {}]  }
   0x1   :  { %12 = vsyncpa [#allocation7], 0 }
   0x2   :  { %13 = vsyncpa [#allocation10], 0  ;;  %s30_s20 = sshll.u32 %s666_s1, 4  ;;  %s31_s20 = int_to_ptr.hbm [resolvable:$true] %s30_s20 }
   0x3   :  { %14 = vsyncpa [#allocation5], 0  ;;  %s604_s21 = smov [#allocation6]   ;;  %s20_s25 = sshll.u32 %s665_s0, 4  ;;  %s21_s25 = int_to_ptr.hbm [resolvable:$true] %s20_s25 }
   0x4   :  { %s32_s22 = sshll.u32 %s604_s21, 4  ;;  %s605_s26 = smov 64   ;;  %s33_s22 = int_to_ptr.vmem [resolvable:$true] %s32_s22 }
   0x5   :  { %s606_s27 = smov 4   ;;  %s607_s28 = smov [#allocation3]  }
   0x6   :  { %38 = dma.hbm_to_vmem [thread:$0]  %s31_s20, 1024, %s33_s22, [#allocation7], %s605_s26, %s605_s26, %s606_s27  }
   0x7   :  { %s22_s29 = sshll.u32 %s607_s28, 4  ;;  %s44_s7 = sshll.u32 %s667_s2, 4  ;;  %s23_s29 = int_to_ptr.vmem [resolvable:$true] %s22_s29  ;;  %s45_s7 = int_to_ptr.hbm [resolvable:$true] %s44_s7 }
   0x8   :  { %25 = dma.hbm_to_vmem [thread:$0]  %s21_s25, 64, %s23_s29, [#allocation4]  }
   0x9   :  { %s54_s9 = sshll.u32 %s668_s3, 4  ;;  %s608_s10 = smov [#allocation8]   ;;  %s55_s9 = int_to_ptr.hbm [resolvable:$true] %s54_s9 }
   0xa   :  { %s46_s11 = sshll.u32 %s608_s10, 4  ;;  %s609_s0 = smov [#allocation9]   ;;  %s47_s11 = int_to_ptr.vmem [resolvable:$true] %s46_s11 }
   0xb   :  { %49 = dma.hbm_to_vmem [thread:$0]  %s45_s7, 64, %s47_s11, [#allocation7]  }
   0xc   :  { %s56_s12 = sshll.u32 %s609_s0, 4  ;;  %s57_s12 = int_to_ptr.vmem [resolvable:$true] %s56_s12 }
   0xd   :  { %62 = dma.hbm_to_vmem [thread:$0]  %s55_s9, 1024, %s57_s12, [#allocation10], %s605_s26, %s605_s26, %s606_s27  }
   0xe   :  { %596 = dma.done.wait [#allocation4], 64  }
   0xf   :  { %597 = vsyncadd [#allocation4], 4294967232 }
  0x10   :  { %598 = dma.done.wait [#allocation7], 1088  }
  0x11   :  { %599 = vsyncadd [#allocation7], 4294966208 }
  0x12   :  { %600 = dma.done.wait [#allocation10], 1024  }
  0x13   :  { %601 = vsyncadd [#allocation10], 4294966272  ;;  %v456_v0 = vld [vmem:[#allocation6 + $0x38] sm:$0xff]  ;;  %v455_v2 = vld [vmem:[#allocation6 + $0x30] sm:$0xff]  ;;  %v300_v47 = vlaneseq  ;;  %v284_v50 = vstv %s669_s4  ;;  %vm306_vm6 = vcmask 64512   ;;  %vm323_vm8 = vcmask 7168  }
  0x14   :  { %v464_v1 = vld [vmem:[#allocation9 + $0x38] sm:$0xff]  ;;  %147 = vmatpush.bf16.msra.mxu0 %v456_v0  ;;  %v463_v3 = vld [vmem:[#allocation9 + $0x30] sm:$0xff]  ;;  %v454_v4 = vld [vmem:[#allocation6 + $0x28] sm:$0xff]  ;;  %s372_s18 = sshll.u32 %s670_s5, 4  ;;  %s610_s21 = smov [#allocation11]   ;;  %s373_s18 = int_to_ptr.hbm [resolvable:$true] %s372_s18 }
  0x15   :  { %225 = vmatpush.bf16.msra.mxu1 %v464_v1  ;;  %v462_v5 = vld [vmem:[#allocation9 + $0x28] sm:$0xff]  ;;  %v453_v6 = vld [vmem:[#allocation6 + $0x20] sm:$0xff]  ;;  %v452_v8 = vld [vmem:[#allocation6 + $0x18] sm:$0xff]  ;;  %v301_v48 = vshrl.u32 %v300_v47, 7  ;;  %v303_v49 = vand.u32 127, %v300_v47 }
  0x16   :  { %v461_v7 = vld [vmem:[#allocation9 + $0x20] sm:$0xff]  ;;  %v460_v9 = vld [vmem:[#allocation9 + $0x18] sm:$0xff]  ;;  %v451_v10 = vld [vmem:[#allocation6 + $0x10] sm:$0xff] }
  0x17   :  { %v459_v11 = vld [vmem:[#allocation9 + $0x10] sm:$0xff]  ;;  %v450_v12 = vld [vmem:[#allocation6 + $0x8] sm:$0xff]  ;;  %v449_v14 = vld [vmem:[#allocation6] sm:$0xff]  ;;  %vm304_vm7 = vcmp.eq.s32.totalorder %v301_v48, %v303_v49 }
  0x18   :  { %148 = vmatpush.bf16.msra.mxu0 %v455_v2  ;;  %v458_v13 = vld [vmem:[#allocation9 + $0x8] sm:$0xff]  ;;  %v457_v15 = vld [vmem:[#allocation9] sm:$0xff]  ;;  %v82_v16 = vld [vmem:[#allocation3] sm:$0xf] }
  0x19   :  { %226 = vmatpush.bf16.msra.mxu1 %v463_v3  ;;  %v160_v17 = vld [vmem:[#allocation8] sm:$0xf] }
  0x1c   :  { %149 = vmatpush.bf16.msra.mxu0 %v454_v4 }
  0x1d   :  { %227 = vmatpush.bf16.msra.mxu1 %v462_v5 }
  0x20   :  { %150 = vmatpush.bf16.msra.mxu0 %v453_v6 }
  0x21   :  { %228 = vmatpush.bf16.msra.mxu1 %v461_v7 }
  0x24   :  { %151 = vmatpush.bf16.msra.mxu0 %v452_v8 }
  0x25   :  { %229 = vmatpush.bf16.msra.mxu1 %v460_v9 }
  0x28   :  { %152 = vmatpush.bf16.msra.mxu0 %v451_v10 }
  0x29   :  { %230 = vmatpush.bf16.msra.mxu1 %v459_v11 }
  0x2c   :  { %153 = vmatpush.bf16.msra.mxu0 %v450_v12 }
  0x2d   :  { %231 = vmatpush.bf16.msra.mxu1 %v458_v13 }
  0x30   :  { %154 = vmatpush.bf16.msra.mxu0 %v449_v14 }
  0x31   :  { %232 = vmatpush.bf16.msra.mxu1 %v457_v15 }
  0x33   :  { %155 = vmatmul.bf16.vlgmr.msra.gmra.mxu0 %v82_v16 }
  0x34   :  { %233 = vmatmul.bf16.vlgmr.msra.gmra.mxu1 %v160_v17 }
  0xb0   :  { %v156_v18 = vpop.f32.mrf.mxu0 }
  0xb1   :  { %v234_v19 = vpop.f32.mrf.mxu1  ;;  %v238_v20 = vmul.f32 %v156_v18, %v156_v18 }
  0xb2   :  { %v253_v21 = vmul.f32 %v234_v19, %v234_v19 }
  0xb3   :  { %239 = vadd.xlane.f32.xlu0 %v238_v20 }
  0xb8   :  { %v158_v22 = vpop.f32.mrf.mxu0 }
  0xb9   :  { %v236_v23 = vpop.f32.mrf.mxu1 }
  0xbb   :  { %254 = vadd.xlane.f32.xlu0 %v253_v21 }
 0x126   :  { %v240_v24 = vpop.xlane.xlu0 %239 }
 0x127   :  { %v241_v25 = vadd.f32 1e-12, %v240_v24 }
 0x129   :  { %476 = vrsqrt.f32 %v241_v25  ;;  %vm248_vm1 = vweird.f32 %v241_v25 }
 0x12e   :  { %v255_v26 = vpop.xlane.xlu0 %254 }
 0x12f   :  { %v477_v27 = vpop.eup %476  ;;  %v256_v28 = vadd.f32 1e-12, %v255_v26 }
 0x130   :  { %v243_v29 = vmul.f32 %v477_v27, %v241_v25  ;;  %vm249_vm0 = vweird.f32 %v477_v27 }
 0x131   :  { %478 = vrsqrt.f32 %v256_v28  ;;  %vm250_vm2 = vmor %vm248_vm1, %vm249_vm0  ;;  %vm263_vm4 = vweird.f32 %v256_v28 }
 0x132   :  { %v244_v30 = vmul.f32 %v477_v27, %v243_v29 }
 0x134   :  { %v245_v31 = vmul.f32 0.5, %v244_v30 }
 0x136   :  { %v246_v32 = vsub.f32 1.5, %v245_v31 }
 0x137   :  { %v479_v33 = vpop.eup %478 }
 0x138   :  { %v258_v34 = vmul.f32 %v479_v33, %v256_v28  ;;  %v247_v35 = vmul.f32 %v477_v27, %v246_v32  ;;  %vm264_vm3 = vweird.f32 %v479_v33 }
 0x139   :  { %vm265_vm5 = vmor %vm263_vm4, %vm264_vm3 }
 0x13a   :  { %v259_v36 = vmul.f32 %v479_v33, %v258_v34  ;;  %v251_v37 = vsel %vm250_vm2, %v477_v27, %v247_v35 }
 0x13b   :  { %v252_v38 = vmul.f32 %v251_v37, %v156_v18 }
 0x13c   :  { %v260_v39 = vmul.f32 0.5, %v259_v36 }
 0x13d   :  { %v269_v40 = vpack.c.bf16 %v252_v38, %v252_v38 }
 0x13e   :  { %v261_v41 = vsub.f32 1.5, %v260_v39 }
 0x13f   :  { %293 = vmatpush.bf16.xpose.msra.mxu3 %v269_v40 }
 0x140   :  { %v262_v42 = vmul.f32 %v479_v33, %v261_v41 }
 0x142   :  { %v266_v43 = vsel %vm265_vm5, %v479_v33, %v262_v42 }
 0x143   :  { %v267_v44 = vmul.f32 %v266_v43, %v234_v19 }
 0x145   :  { %v270_v45 = vpack.c.bf16 %v267_v44, %v267_v44 }
 0x147   :  { %278 = vmatpush.bf16.xpose.msra.mxu2 %v270_v45  ;;  %294 = vmatmul.bf16.vlgmr.msra.gmra.mxu3 %v270_v45 }
 0x14e   :  { %279 = vmatmul.bf16.vlgmr.msra.gmra.mxu2 %v269_v40 }
 0x1ca   :  { %v295_v46 = vpop.f32.mrf.mxu3 }
 0x1cb   :  { %v299_v57 = vmul.f32 %v295_v46, %v284_v50 }
 0x1cd   :  { %v339_v59 = vsel %vm306_vm6, %v299_v57, -inf  ;;  %v335_v60 = vsel %vm304_vm7, %v299_v57, 0.0 }
 0x1ce   :  { %v336_v61 = vsel %vm306_vm6, %v335_v60, 0.0 }
 0x1d1   :  { %v280_v51 = vpop.f32.mrf.mxu2 }
 0x1d2   :  { %v285_v52 = vmul.f32 %v284_v50, %v280_v51  ;;  %v297_v53 = vpop.f32.mrf.mxu3 }
 0x1d4   :  { %v310_v54 = vsel %vm306_vm6, %v285_v52, -inf  ;;  %v305_v55 = vsel %vm304_vm7, %v285_v52, 0.0 }
 0x1d5   :  { %311 = vmax.xlane.f32.xlu1 %v310_v54  ;;  %v307_v56 = vsel %vm306_vm6, %v305_v55, 0.0 }
 0x1d6   :  { %308 = vadd.xlane.f32.xlu0 %v307_v56 }
 0x1d9   :  { %v282_v58 = vpop.f32.mrf.mxu2 }
 0x1dd   :  { %340 = vmax.xlane.f32.xlu1 %v339_v59 }
 0x1e5   :  { %337 = vadd.xlane.f32.xlu1 %v336_v61 }
 0x248   :  { %v312_v62 = vpop.xlane.xlu1 %311 }
 0x249   :  { %v313_v63 = vsub.f32 %v285_v52, %v312_v62  ;;  %v309_v13 = vpop.xlane.xlu0 %308 }
 0x24b   :  { %v314_v0 = vmul.f32 1.442695, %v313_v63 }
 0x24d   :  { %480 = vpow2.f32 %v314_v0 }
 0x250   :  { %v341_v1 = vpop.xlane.xlu1 %340 }
 0x251   :  { %v342_v2 = vsub.f32 %v299_v57, %v341_v1 }
 0x253   :  { %v481_v3 = vpop.eup %480  ;;  %v343_v4 = vmul.f32 1.442695, %v342_v2 }
 0x254   :  { %v316_v5 = vsel %vm306_vm6, %v481_v3, 0.0 }
 0x255   :  { %482 = vpow2.f32 %v343_v4  ;;  %317 = vadd.xlane.f32.xlu2 %v316_v5 }
 0x258   :  { %v338_v19 = vpop.xlane.xlu1 %337 }
 0x25b   :  { %v483_v6 = vpop.eup %482 }
 0x25c   :  { %v345_v7 = vsel %vm306_vm6, %v483_v6, 0.0 }
 0x25d   :  { %346 = vadd.xlane.f32.xlu2 %v345_v7 }
 0x2c8   :  { %v318_v8 = vpop.xlane.xlu2 %317 }
 0x2c9   :  { %484 = vlog2.f32 %v318_v8 }
 0x2cf   :  { %v485_v9 = vpop.eup %484 }
 0x2d0   :  { %v320_v10 = vmul.f32 0.6931472, %v485_v9  ;;  %v347_v11 = vpop.xlane.xlu2 %346 }
 0x2d1   :  { %486 = vlog2.f32 %v347_v11 }
 0x2d2   :  { %v321_v12 = vadd.f32 %v320_v10, %v312_v62 }
 0x2d4   :  { %v322_v14 = vsub.f32 %v321_v12, %v309_v13 }
 0x2d6   :  { %v324_v15 = vsel %vm323_vm8, %v322_v14, 0.0 }
 0x2d7   :  { %v487_v16 = vpop.eup %486  ;;  %325 = vadd.xlane.f32.xlu2 %v324_v15 }
 0x2d8   :  { %v349_v17 = vmul.f32 0.6931472, %v487_v16 }
 0x2da   :  { %v350_v18 = vadd.f32 %v349_v17, %v341_v1 }
 0x2dc   :  { %v351_v20 = vsub.f32 %v350_v18, %v338_v19 }
 0x2de   :  { %v352_v21 = vsel %vm323_vm8, %v351_v20, 0.0 }
 0x2df   :  { %353 = vadd.xlane.f32.xlu0 %v352_v21 }
 0x34a   :  { %v326_v22 = vpop.xlane.xlu2 %325 }
 0x34b   :  { %v327_v23 = vrot.slane %v326_v22, 4 }
 0x34d   :  { %v328_v24 = vadd.f32 %v327_v23, %v326_v22 }
 0x34f   :  { %v329_v25 = vrot.slane %v328_v24, 2 }
 0x351   :  { %v330_v26 = vadd.f32 %v329_v25, %v328_v24 }
 0x352   :  { %v354_v27 = vpop.xlane.xlu0 %353 }
 0x353   :  { %v355_v28 = vrot.slane %v354_v27, 4  ;;  %v331_v29 = vrot.slane %v330_v26, 1 }
 0x355   :  { %v356_v30 = vadd.f32 %v355_v28, %v354_v27  ;;  %v332_v31 = vadd.f32 %v331_v29, %v330_v26 }
 0x357   :  { %v357_v32 = vrot.slane %v356_v30, 2  ;;  %465 = vpush %v332_v31 }
 0x359   :  { %v358_v33 = vadd.f32 %v357_v32, %v356_v30 }
 0x35b   :  { %v359_v34 = vrot.slane %v358_v33, 1 }
 0x35d   :  { %v360_v35 = vadd.f32 %v359_v34, %v358_v33 }
 0x35f   :  { %467 = vpush %v360_v35 }
 0x388   :  { %s466_s4 = spop %465 }
 0x389   :  { %s334_s13 = smul.f32 0.125, %s466_s4 }
 0x390   :  { %s468_s14 = spop %467 }
 0x391   :  { %s362_s15 = smul.f32 0.125, %s468_s14 }
 0x393   :  { %s363_s19 = sadd.f32 %s362_s15, %s334_s13 }
 0x395   :  { %s364_s20 = smul.f32 0.5, %s363_s19 }
 0x397   :  { %366 = sst [smem:[#allocation11]] %s364_s20 }
 0x398   :  { %375 = dma.smem_to_hbm %s610_s21, 16, %s373_s18, [#allocation5]  }
 0x399   :  { %602 = dma.done.wait [#allocation5], 16  }
 0x39a   :  { %603 = vsyncadd [#allocation5], 4294967280 }
 0x39b   :  { %380 = sfence }
 0x39c   :  { %381 = vsyncpa [#allocation4], 1 }
 0x39d   :  { %382 = vsyncpa [#allocation7], 1 }
 0x39e   :  { %383 = vsyncpa [#allocation10], 1 }
 0x39f   :  { %384 = vsyncpa [#allocation5], 1 }

</bundles_post_ra>
